<compile_context>
chip_gen: v6e
topology: v6e:2x2x1
jax: 0.10.0
libtpu: 0.0.40
codegen_flags: <defaults>
</compile_context>

<pallas_src>
import jax
import jax.numpy as jnp
from jax.experimental import pallas as pl
from jax.experimental.pallas import tpu as pltpu

B = 2            # batch
S = 32           # source (phoneme) length -- fixed by .expand(-1, 32, -1)
D = 256          # hidden size            -- fixed by nn.Embedding(6, 256)
HP = 64          # variance-predictor hidden size
T_MEL = 64       # static max mel length
FFN = 256        # generator FFN hidden size
N_MELS = 16      # mel channels (small)
N_PITCH_BINS = 64
N_SPEAKERS = 6


def _const_spec(shape):
    """BlockSpec covering the whole array, resident across the grid."""
    nz = (0,) * len(shape)
    return pl.BlockSpec(shape, lambda *_args, _nz=nz: _nz)


# --------------------------------------------------------------------------
# Kernel A: speaker add + fused duration/pitch predictor MLPs
#   in : pre_c (B*S, D), spk (B*S, D), w1 (D, 2*HP) bf16, b1 (1, 2*HP),
#        w2 (2*HP, 2) block-diag bf16, b2 (1, 2)
#   out: x (B*S, D) f32, pred (B*S, 2) f32  (col 0 = log_d, col 1 = p_pred)
# --------------------------------------------------------------------------
def _va_predictor_kernel(pre_ref, spk_ref, w1_ref, b1_ref, w2_ref, b2_ref,
                         x_out_ref, pred_ref):
    x = pre_ref[...] + spk_ref[...]                              # (B*S, D) f32
    x_out_ref[...] = x
    h = jnp.maximum(
        jnp.dot(x.astype(jnp.bfloat16), w1_ref[...],
                preferred_element_type=jnp.float32) + b1_ref[...], 0.0)
    pred_ref[...] = (jnp.dot(h.astype(jnp.bfloat16), w2_ref[...],
                             preferred_element_type=jnp.float32) + b2_ref[...])


def variance_predictors(pre_flat, spk_rows, w1, b1, w2, b2):
    n = pre_flat.shape[0]
    return pl.pallas_call(
        _va_predictor_kernel,
        out_shape=(jax.ShapeDtypeStruct((n, D), jnp.float32),
                   jax.ShapeDtypeStruct((n, 2), jnp.float32)),
        grid=(1,),
        in_specs=[_const_spec(pre_flat.shape), _const_spec(spk_rows.shape),
                  _const_spec(w1.shape), _const_spec(b1.shape),
                  _const_spec(w2.shape), _const_spec(b2.shape)],
        out_specs=(_const_spec((n, D)), _const_spec((n, 2))),
        compiler_params=pltpu.CompilerParams(dimension_semantics=("arbitrary",)),
    )(pre_flat, spk_rows, w1, b1, w2, b2)


# --------------------------------------------------------------------------
# Kernel B: fused {formant generator + excitation generator + decoder}
#   scalar prefetch: mel_lens (B,) int32 in SMEM -> masks built in-kernel
#   one_hot (B, T, S): in-kernel length-regulation gather via MXU matmul
# --------------------------------------------------------------------------
def _gen_decoder_kernel(mel_len_ref,
                        oh_ref, x_ref, pemb_ref,
                        e_wq_ref,
                        f_wv_ref, f_w1_ref, f_b1_ref, f_w2_ref, f_b2_ref,
                        e_wv_ref, e_w1_ref, e_b1_ref, e_w2_ref, e_b2_ref,
                        wmel_ref, bmel_ref,
                        mel_ref):
    b = pl.program_id(0)
    ml = mel_len_ref[b]                                          # scalar int32

    col_ids = jax.lax.broadcasted_iota(jnp.int32, (1, T_MEL), 1)
    row_ids = jax.lax.broadcasted_iota(jnp.int32, (T_MEL, 1), 0)
    neg_mask = jnp.where(col_ids >= ml, jnp.float32(-1e9), jnp.float32(0.0))  # keys
    row_keep = (row_ids < ml).astype(jnp.float32)                # zero padded frames

    # length regulation: ragged repeat done as one-hot gather on the MXU
    oh = oh_ref[0]                                               # (T, S) f32
    h = jnp.dot(oh, x_ref[0], preferred_element_type=jnp.float32)      # (T, D)
    p = jnp.dot(oh, pemb_ref[0], preferred_element_type=jnp.float32)   # (T, D)
    h_bf = h.astype(jnp.bfloat16)
    p_bf = p.astype(jnp.bfloat16)

    scale = jnp.float32(1.0 / (D ** 0.5))

    def attention_ffn(q_bf, kv_bf, wv_ref, w1_ref, b1_ref, w2_ref, b2_ref):
        scores = jax.lax.dot_general(q_bf, kv_bf, (((1,), (1,)), ((), ())),
                                     preferred_element_type=jnp.float32)  # (T, T)
        scores = scores * scale + neg_mask
        m = jnp.max(scores, axis=-1, keepdims=True)
        e = jnp.exp(scores - m)
        attn = e * pl.reciprocal(jnp.sum(e, axis=-1, keepdims=True), approx=True)
        v = jnp.dot(kv_bf, wv_ref[...], preferred_element_type=jnp.float32)
        ctx = jnp.dot(attn.astype(jnp.bfloat16), v.astype(jnp.bfloat16),
                      preferred_element_type=jnp.float32)        # (T, D) f32
        h1 = jnp.maximum(
            jnp.dot(ctx.astype(jnp.bfloat16), w1_ref[...],
                    preferred_element_type=jnp.float32) + b1_ref[...], 0.0)
        out = (jnp.dot(h1.astype(jnp.bfloat16), w2_ref[...],
                       preferred_element_type=jnp.float32) + b2_ref[...] + ctx)
        return out * row_keep

    # formant generator: no query projection (identity Wq dropped), q = kv = h
    formant = attention_ffn(h_bf, h_bf, f_wv_ref,
                            f_w1_ref, f_b1_ref, f_w2_ref, f_b2_ref)
    # excitation generator: query_projection=True, query built from h, kv = pitch
    q_e = jnp.dot(h_bf, e_wq_ref[...], preferred_element_type=jnp.float32)
    excitation = attention_ffn(q_e.astype(jnp.bfloat16), p_bf, e_wv_ref,
                               e_w1_ref, e_b1_ref, e_w2_ref, e_b2_ref)

    # decoder: sum hidden streams, project to mel, re-mask padded frames
    mel = (jnp.dot((formant + excitation).astype(jnp.bfloat16), wmel_ref[...],
                   preferred_element_type=jnp.float32) + bmel_ref[...])
    mel_ref[0] = mel * row_keep


def generator_decoder(mel_lens, one_hot, x, pitch_emb, params):
    weights = (params["e_wq"],
               params["f_wv"], params["f_w1"], params["f_b1"],
               params["f_w2"], params["f_b2"],
               params["e_wv"], params["e_w1"], params["e_b1"],
               params["e_w2"], params["e_b2"],
               params["wmel"], params["bmel"])

    def wspec(arr):
        nz = (0,) * arr.ndim
        return pl.BlockSpec(arr.shape, lambda b, ml, _nz=nz: _nz)

    grid_spec = pltpu.PrefetchScalarGridSpec(
        num_scalar_prefetch=1,
        grid=(B,),
        in_specs=[pl.BlockSpec((1, T_MEL, S), lambda b, ml: (b, 0, 0)),
                  pl.BlockSpec((1, S, D), lambda b, ml: (b, 0, 0)),
                  pl.BlockSpec((1, S, D), lambda b, ml: (b, 0, 0))]
                 + [wspec(w) for w in weights],
        out_specs=pl.BlockSpec((1, T_MEL, N_MELS), lambda b, ml: (b, 0, 0)),
    )
    return pl.pallas_call(
        _gen_decoder_kernel,
        out_shape=jax.ShapeDtypeStruct((B, T_MEL, N_MELS), jnp.float32),
        grid_spec=grid_spec,
        compiler_params=pltpu.CompilerParams(dimension_semantics=("parallel",)),
    )(mel_lens, one_hot, x, pitch_emb, *weights)


# --------------------------------------------------------------------------
# Parameters (deterministic synthetic init; MXU weights stored in bf16)
# --------------------------------------------------------------------------
def init_params(key):
    ks = jax.random.split(key, 16)

    def w(k, shape, scale=0.02):
        return (scale * jax.random.normal(k, shape)).astype(jnp.float32)

    # variance predictors: concat first layers, block-diag second layer
    wd1 = w(ks[2], (D, HP))
    wp1 = w(ks[4], (D, HP))
    wd2 = w(ks[3], (HP, 1))
    wp2 = w(ks[5], (HP, 1))
    w1cat = jnp.concatenate([wd1, wp1], axis=1).astype(jnp.bfloat16)    # (D, 2*HP)
    b1cat = jnp.zeros((1, 2 * HP), jnp.float32)
    w2cat = jnp.zeros((2 * HP, 2), jnp.float32)
    w2cat = w2cat.at[:HP, 0].set(wd2[:, 0]).at[HP:, 1].set(wp2[:, 0])
    w2cat = w2cat.astype(jnp.bfloat16)                                  # (2*HP, 2)
    b2cat = jnp.concatenate([jnp.ones((1, 1), jnp.float32),   # bd2 ~ 2 frames/token
                             jnp.zeros((1, 1), jnp.float32)], axis=1)   # (1, 2)

    return dict(
        speaker_emb=w(ks[0], (N_SPEAKERS, D), 0.1),      # nn.Embedding(6, 256)
        pitch_emb=w(ks[1], (N_PITCH_BINS, D), 0.1),
        w1cat=w1cat, b1cat=b1cat, w2cat=w2cat, b2cat=b2cat,
        # formant generator (query projection is identity -> dropped entirely)
        f_wv=w(ks[6], (D, D)).astype(jnp.bfloat16),
        f_w1=w(ks[7], (D, FFN)).astype(jnp.bfloat16),
        f_b1=jnp.zeros((1, FFN), jnp.float32),
        f_w2=w(ks[8], (FFN, D)).astype(jnp.bfloat16),
        f_b2=jnp.zeros((1, D), jnp.float32),
        # excitation generator (query_projection=True, query = Wq h)
        e_wq=w(ks[9], (D, D)).astype(jnp.bfloat16),
        e_wv=w(ks[10], (D, D)).astype(jnp.bfloat16),
        e_w1=w(ks[11], (D, FFN)).astype(jnp.bfloat16),
        e_b1=jnp.zeros((1, FFN), jnp.float32),
        e_w2=w(ks[12], (FFN, D)).astype(jnp.bfloat16),
        e_b2=jnp.zeros((1, D), jnp.float32),
        # decoder mel projection
        wmel=w(ks[13], (D, N_MELS)).astype(jnp.bfloat16),
        bmel=jnp.zeros((1, N_MELS), jnp.float32),
    )


# --------------------------------------------------------------------------
# Full forward (inference path: p_targets = d_targets = mels = None)
# --------------------------------------------------------------------------
def fastpitch_formant_forward(params, speakers, pre_c, max_src_len=S,
                              p_control=1.0, d_control=1.0):
    src_masks = None          # src_lens is None in the reference forward
    src_lens = None

    # speaker_emb(speakers).unsqueeze(1).expand(-1, 32, -1); add done in kernel A
    spk = params["speaker_emb"][speakers]                          # (B, D)
    spk_rows = jnp.broadcast_to(spk[:, None, :], (B, S, D)).reshape(B * S, D)
    pre_flat = pre_c.reshape(B * S, D)

    x_flat, pred = variance_predictors(pre_flat, spk_rows,
                                       params["w1cat"], params["b1cat"],
                                       params["w2cat"], params["b2cat"])
    x = x_flat.reshape(B, S, D)
    pred = pred.reshape(B, S, 2)
    log_d = pred[..., 0]                                           # (B, S)
    p_pred = pred[..., 1]                                          # (B, S)

    # durations + length-regulation indices (ragged; stays in XLA glue)
    d_rounded = jnp.maximum(jnp.round((jnp.exp(log_d) - 1.0) * d_control), 0.0)
    durations = d_rounded.astype(jnp.int32)
    cum = jnp.cumsum(durations, axis=1)                            # (B, S)
    mel_lens = jnp.minimum(cum[:, -1], T_MEL).astype(jnp.int32)
    frames = jnp.arange(T_MEL, dtype=jnp.int32)
    idx = jax.vmap(lambda c: jnp.searchsorted(c, frames, side="right"))(cum)
    idx = jnp.minimum(idx, S - 1)
    one_hot = jax.nn.one_hot(idx, S, dtype=jnp.float32)            # (B, T, S)
    mel_masks = frames[None, :] >= mel_lens[:, None]               # True = padding

    # pitch bucketize + embedding lookup (glue gather)
    p_scaled = p_pred * p_control
    bins = jnp.linspace(-1.0, 1.0, N_PITCH_BINS - 1)
    pitch_emb = params["pitch_emb"][jnp.searchsorted(bins, p_scaled)]   # (B, S, D)

    # fused generators + decoder (gather, masks, attention, FFN, mel proj)
    mel = generator_decoder(mel_lens, one_hot, x, pitch_emb, params)
    mel_iters = [mel]   # TODO(synk): real Decoder emits one mel per iteration block

    return (mel_iters, p_pred, log_d, d_rounded,
            src_masks, mel_masks, src_lens, mel_lens)


if __name__ == "__main__":
    key = jax.random.PRNGKey(0)
    k_par, k_in = jax.random.split(key)
    params = init_params(k_par)

    speakers = jnp.array([0, 3], dtype=jnp.int32)                  # (B,)
    pre_c = (0.5 * jax.random.normal(k_in, (B, S, D))).astype(jnp.float32)

    outs = fastpitch_formant_forward(params, speakers, pre_c, max_src_len=S)
    (mel_iters, p_pred, log_d, d_rounded,
     src_masks, mel_masks, src_lens, mel_lens) = outs

    jax.block_until_ready(mel_iters[0])
    jax.block_until_ready(p_pred)
    jax.block_until_ready(mel_lens)
    assert mel_iters[0].shape == (B, T_MEL, N_MELS)
    assert p_pred.shape == (B, S) and log_d.shape == (B, S)
    assert bool(jnp.all(jnp.isfinite(mel_iters[0])))
    print("KERNEL_OK")
</pallas_src>

<mosaic_0001>
module attributes {stable_mosaic.version = 11 : i64} {
  func.func @_va_predictor_kernel(%arg0: i32, %arg1: memref<64x256xf32, #tpu.memory_space<vmem>>, %arg2: memref<64x256xf32, #tpu.memory_space<vmem>>, %arg3: memref<256x128xbf16, #tpu.memory_space<vmem>>, %arg4: memref<1x128xf32, #tpu.memory_space<vmem>>, %arg5: memref<128x2xbf16, #tpu.memory_space<vmem>>, %arg6: memref<1x2xf32, #tpu.memory_space<vmem>>, %arg7: memref<64x256xf32, #tpu.memory_space<vmem>>, %arg8: memref<64x2xf32, #tpu.memory_space<vmem>>) attributes {dimension_semantics = [#tpu.dimension_semantics<arbitrary>], iteration_bounds = array<i64: 1>, scalar_prefetch = 0 : i64, scratch_operands = 0 : i64, tpu.core_type = #tpu.core_type<tc>, window_params = [{pipeline_mode = #tpu.pipeline_mode<synchronous>, transform_indices = @transform_0, window_bounds = array<i64: 64, 256>}, {pipeline_mode = #tpu.pipeline_mode<synchronous>, transform_indices = @transform_1, window_bounds = array<i64: 64, 256>}, {pipeline_mode = #tpu.pipeline_mode<synchronous>, transform_indices = @transform_2, window_bounds = array<i64: 256, 128>}, {pipeline_mode = #tpu.pipeline_mode<synchronous>, transform_indices = @transform_3, window_bounds = array<i64: 1, 128>}, {pipeline_mode = #tpu.pipeline_mode<synchronous>, transform_indices = @transform_4, window_bounds = array<i64: 128, 2>}, {pipeline_mode = #tpu.pipeline_mode<synchronous>, transform_indices = @transform_5, window_bounds = array<i64: 1, 2>}, {pipeline_mode = #tpu.pipeline_mode<synchronous>, transform_indices = @transform_6, window_bounds = array<i64: 64, 256>}, {pipeline_mode = #tpu.pipeline_mode<synchronous>, transform_indices = @transform_7, window_bounds = array<i64: 64, 2>}]} {
    %c0 = arith.constant 0 : index
    %c0_0 = arith.constant 0 : index
    %0 = vector.load %arg1[%c0, %c0_0] : memref<64x256xf32, #tpu.memory_space<vmem>>, vector<64x256xf32>
    %c0_1 = arith.constant 0 : index
    %c0_2 = arith.constant 0 : index
    %1 = vector.load %arg2[%c0_1, %c0_2] : memref<64x256xf32, #tpu.memory_space<vmem>>, vector<64x256xf32>
    %2 = arith.addf %0, %1 : vector<64x256xf32>
    %c0_3 = arith.constant 0 : index
    %c0_4 = arith.constant 0 : index
    %3 = vector.load %arg7[%c0_3, %c0_4] : memref<64x256xf32, #tpu.memory_space<vmem>>, vector<64x256xf32>
    tpu.vector_store %arg7[%c0_3, %c0_4], %2 {strides = array<i32>} : memref<64x256xf32, #tpu.memory_space<vmem>>, vector<64x256xf32>,
    %4 = arith.truncf %2 : vector<64x256xf32> to vector<64x256xbf16>
    %c0_5 = arith.constant 0 : index
    %c0_6 = arith.constant 0 : index
    %5 = vector.load %arg3[%c0_5, %c0_6] : memref<256x128xbf16, #tpu.memory_space<vmem>>, vector<256x128xbf16>
    %cst = arith.constant dense<0.000000e+00> : vector<64x128xf32>
    %6 = tpu.matmul %4, %5, %cst {dimension_numbers = #tpu.dot_dimension_numbers<[1], [0], [0], [1], [0, 0, 1, 1], [], []>} : vector<64x256xbf16>, vector<256x128xbf16>, vector<64x128xf32> -> vector<64x128xf32>
    %c0_7 = arith.constant 0 : index
    %c0_8 = arith.constant 0 : index
    %7 = vector.load %arg4[%c0_7, %c0_8] : memref<1x128xf32, #tpu.memory_space<vmem>>, vector<1x128xf32>
    %8 = vector.broadcast %7 : vector<1x128xf32> to vector<64x128xf32>
    %9 = arith.addf %6, %8 : vector<64x128xf32>
    %cst_9 = arith.constant 0.000000e+00 : f32
    %10 = vector.broadcast %cst_9 : f32 to vector<64x128xf32>
    %11 = arith.maximumf %9, %10 : vector<64x128xf32>
    %12 = arith.truncf %11 : vector<64x128xf32> to vector<64x128xbf16>
    %c0_10 = arith.constant 0 : index
    %c0_11 = arith.constant 0 : index
    %13 = vector.load %arg5[%c0_10, %c0_11] : memref<128x2xbf16, #tpu.memory_space<vmem>>, vector<128x2xbf16>
    %cst_12 = arith.constant dense<0.000000e+00> : vector<64x2xf32>
    %14 = tpu.matmul %12, %13, %cst_12 {dimension_numbers = #tpu.dot_dimension_numbers<[1], [0], [0], [1], [0, 0, 1, 1], [], []>} : vector<64x128xbf16>, vector<128x2xbf16>, vector<64x2xf32> -> vector<64x2xf32>
    %c0_13 = arith.constant 0 : index
    %c0_14 = arith.constant 0 : index
    %15 = vector.load %arg6[%c0_13, %c0_14] : memref<1x2xf32, #tpu.memory_space<vmem>>, vector<1x2xf32>
    %16 = vector.broadcast %15 : vector<1x2xf32> to vector<64x2xf32>
    %17 = arith.addf %14, %16 : vector<64x2xf32>
    %c0_15 = arith.constant 0 : index
    %c0_16 = arith.constant 0 : index
    %18 = vector.load %arg8[%c0_15, %c0_16] : memref<64x2xf32, #tpu.memory_space<vmem>>, vector<64x2xf32>
    tpu.vector_store %arg8[%c0_15, %c0_16], %17 {strides = array<i32>} : memref<64x2xf32, #tpu.memory_space<vmem>>, vector<64x2xf32>,
    return
  }
  func.func @transform_0(%arg0: i32) -> (i32, i32) {
    %c0_i32 = arith.constant 0 : i32
    %c0_i32_0 = arith.constant 0 : i32
    %c0_i32_1 = arith.constant 0 : i32
    return %c0_i32, %c0_i32_0 : i32, i32
  }
  func.func @transform_1(%arg0: i32) -> (i32, i32) {
    %c0_i32 = arith.constant 0 : i32
    %c0_i32_0 = arith.constant 0 : i32
    %c0_i32_1 = arith.constant 0 : i32
    return %c0_i32, %c0_i32_0 : i32, i32
  }
  func.func @transform_2(%arg0: i32) -> (i32, i32) {
    %c0_i32 = arith.constant 0 : i32
    %c0_i32_0 = arith.constant 0 : i32
    %c0_i32_1 = arith.constant 0 : i32
    return %c0_i32, %c0_i32_0 : i32, i32
  }
  func.func @transform_3(%arg0: i32) -> (i32, i32) {
    %c0_i32 = arith.constant 0 : i32
    %c0_i32_0 = arith.constant 0 : i32
    %c0_i32_1 = arith.constant 0 : i32
    return %c0_i32, %c0_i32_0 : i32, i32
  }
  func.func @transform_4(%arg0: i32) -> (i32, i32) {
    %c0_i32 = arith.constant 0 : i32
    %c0_i32_0 = arith.constant 0 : i32
    %c0_i32_1 = arith.constant 0 : i32
    return %c0_i32, %c0_i32_0 : i32, i32
  }
  func.func @transform_5(%arg0: i32) -> (i32, i32) {
    %c0_i32 = arith.constant 0 : i32
    %c0_i32_0 = arith.constant 0 : i32
    %c0_i32_1 = arith.constant 0 : i32
    return %c0_i32, %c0_i32_0 : i32, i32
  }
  func.func @transform_6(%arg0: i32) -> (i32, i32) {
    %c0_i32 = arith.constant 0 : i32
    %c0_i32_0 = arith.constant 0 : i32
    %c0_i32_1 = arith.constant 0 : i32
    return %c0_i32, %c0_i32_0 : i32, i32
  }
  func.func @transform_7(%arg0: i32) -> (i32, i32) {
    %c0_i32 = arith.constant 0 : i32
    %c0_i32_0 = arith.constant 0 : i32
    %c0_i32_1 = arith.constant 0 : i32
    return %c0_i32, %c0_i32_0 : i32, i32
  }
}

</mosaic_0001>

<bundles_post_ra>
// kernel: tpu_custom_call.1
= control target key start
LH: loop header
LB: loop body
LE: loop exit
PB: predicated region body
PF: predicated region fallthrough
CT: control target
= control target key end

     0   :  { %13 = vsyncpa [#allocation3], 0  ;;  %s886_s0 = inlined_call_operand.hbm [shape: f32[64,256], index: 0, kind: input, shape index: {}]   ;;  %s887_s1 = inlined_call_operand.hbm [shape: f32[64,256], index: 1, kind: input, shape index: {}]   ;;  %s888_s2 = inlined_call_operand.hbm [shape: bf16[256,128], index: 2, kind: input, shape index: {}]   ;;  %s889_s3 = inlined_call_operand.vmem [shape: f32[1,128], index: 3, kind: input, shape index: {}]   ;;  %s890_s4 = inlined_call_operand.vmem [shape: bf16[128,2], index: 4, kind: input, shape index: {}]   ;;  %s891_s5 = inlined_call_operand.vmem [shape: f32[1,2], index: 5, kind: input, shape index: {}]   ;;  %s892_s6 = inlined_call_operand.hbm [shape: f32[64,256], index: 6, kind: output, shape index: {0}]   ;;  %s893_s7 = inlined_call_operand.vmem [shape: f32[64,2], index: 7, kind: output, shape index: {1}]  }
   0x1   :  { %14 = vsyncpa [#allocation6], 0 }
   0x2   :  { %15 = vsyncpa [#allocation4], 0  ;;  %s739_s24 = smov [#allocation5]   ;;  %s740_s26 = smov [#allocation2]  }
   0x3   :  { %s33_s25 = sshll.u32 %s739_s24, 4  ;;  %s21_s27 = sshll.u32 %s740_s26, 4  ;;  %s34_s25 = int_to_ptr.vmem [resolvable:$true] %s33_s25  ;;  %s22_s27 = int_to_ptr.vmem [resolvable:$true] %s21_s27 }
   0x4   :  { %s661_s28 = scalar_lea.vmem %s34_s25, 2048  ;;  %p666_p1 = scmp.lt.s32.totalorder %s34_s25, %s34_s25 }
   0x5   :  { %p662_p0 = scmp.ne.s32.totalorder %s34_s25, %s661_s28  ;;  %p667_p2 = scmp.lt.s32.totalorder %s661_s28, %s661_s28 }
   0x7   :  { %p668_p3 = por %p667_p2, %p666_p1 }
   0x9   :  { %p669_p4 = pnand %p668_p3, %p662_p0 }
   0xb   :  { %672 = shalt.err (!%p669_p4)
}
   0xc   :  { %s741_s29 = smov 256   ;;  %s742_s30 = smov 16  }
   0xd   :  { %39 = dma.hbm_to_vmem [thread:$0]  %s887_s1, 2048, %s34_s25, [#allocation6], %s741_s29, %s741_s29, %s742_s30  }
   0xe   :  { %s681_s10 = scalar_lea.vmem %s22_s27, 2048  ;;  %p686_p6 = scmp.lt.s32.totalorder %s22_s27, %s22_s27 }
   0xf   :  { %p682_p5 = scmp.ne.s32.totalorder %s22_s27, %s681_s10  ;;  %p687_p7 = scmp.lt.s32.totalorder %s681_s10, %s681_s10 }
  0x11   :  { %p688_p8 = por %p687_p7, %p686_p6 }
  0x13   :  { %p689_p9 = pnand %p688_p8, %p682_p5 }
  0x15   :  { %692 = shalt.err (!%p689_p9)
}
  0x16   :  { %27 = dma.hbm_to_vmem [thread:$0]  %s886_s0, 2048, %s22_s27, [#allocation3], %s741_s29, %s741_s29, %s742_s30  }
  0x17   :  { %s743_s13 = smov [#allocation7]  }
  0x18   :  { %s45_s14 = sshll.u32 %s743_s13, 4  ;;  %s46_s14 = int_to_ptr.vmem [resolvable:$true] %s45_s14 }
  0x19   :  { %s701_s15 = scalar_lea.vmem %s46_s14, 2048  ;;  %p706_p11 = scmp.lt.s32.totalorder %s46_s14, %s46_s14 }
  0x1a   :  { %p702_p10 = scmp.ne.s32.totalorder %s46_s14, %s701_s15  ;;  %p707_p12 = scmp.lt.s32.totalorder %s701_s15, %s701_s15 }
  0x1c   :  { %p708_p13 = por %p707_p12, %p706_p11 }
  0x1e   :  { %p709_p0 = pnand %p708_p13, %p702_p10 }
  0x20   :  { %712 = shalt.err (!%p709_p0)
}
  0x21   :  { %s744_s1 = smov 64   ;;  %s745_s16 = smov 4  }
  0x22   :  { %51 = dma.hbm_to_vmem [thread:$0]  %s888_s2, 2048, %s46_s14, [#allocation6], %s744_s1, %s744_s1, %s745_s16  }
  0x23   :  { %733 = dma.done.wait [#allocation3], 2048  }
  0x24   :  { %734 = vsyncadd [#allocation3], 4294965248 }
  0x25   :  { %735 = dma.done.wait [#allocation6], 4096  }
  0x26   :  { %736 = vsyncadd [#allocation6], 4294963200  ;;  %v629_v0 = vld [vmem:[#allocation7 + $0x78] sm:$0xff]   ;;  %v631_v2 = vld [vmem:[#allocation7 + $0x70] sm:$0xff]  }
  0x27   :  { %v630_v1 = vld [vmem:[#allocation7 + $0x38] sm:$0xff]   ;;  %545 = vmatprep.subr.bf16.mxu0 %v629_v0  ;;  %v632_v3 = vld [vmem:[#allocation7 + $0x30] sm:$0xff]   ;;  %v633_v4 = vld [vmem:[#allocation7 + $0x68] sm:$0xff]  }
  0x28   :  { %546 = vmatpush3.bf16.msra.mxu0 %v630_v1  ;;  %v634_v5 = vld [vmem:[#allocation7 + $0x28] sm:$0xff]   ;;  %v635_v6 = vld [vmem:[#allocation7 + $0x60] sm:$0xff]   ;;  %v637_v8 = vld [vmem:[#allocation7 + $0x58] sm:$0xff]  }
  0x29   :  { %547 = vmatprep.subr.bf16.mxu0 %v631_v2  ;;  %v636_v7 = vld [vmem:[#allocation7 + $0x20] sm:$0xff]   ;;  %v638_v9 = vld [vmem:[#allocation7 + $0x18] sm:$0xff]   ;;  %v639_v10 = vld [vmem:[#allocation7 + $0x50] sm:$0xff]  }
  0x2a   :  { %v69_v11 = vld [vmem:[#allocation2 + $0x8] sm:$0xff]  ;;  %v71_v12 = vld [vmem:[#allocation2 + $0x18] sm:$0xff]  ;;  %v640_v14 = vld [vmem:[#allocation7 + $0x10] sm:$0xff]  }
  0x2b   :  { %v85_v13 = vld [vmem:[#allocation5 + $0x8] sm:$0xff]  ;;  %v87_v15 = vld [vmem:[#allocation5 + $0x18] sm:$0xff]  ;;  %v68_v17 = vld [vmem:[#allocation2] sm:$0xff] }
  0x2c   :  { %548 = vmatpush3.bf16.msra.mxu0 %v632_v3  ;;  %v101_v16 = vadd.f32 %v85_v13, %v69_v11  ;;  %v70_v18 = vld [vmem:[#allocation2 + $0x10] sm:$0xff]  ;;  %v641_v19 = vld [vmem:[#allocation7 + $0x48] sm:$0xff]   ;;  %v103_v20 = vadd.f32 %v87_v15, %v71_v12  ;;  %v84_v21 = vld [vmem:[#allocation5] sm:$0xff] }
  0x2d   :  { %549 = vmatprep.subr.bf16.mxu0 %v633_v4  ;;  %v86_v22 = vld [vmem:[#allocation5 + $0x10] sm:$0xff]  ;;  %v73_v23 = vld [vmem:[#allocation2 + $0x28] sm:$0xff]  ;;  %v802_v24 = vadd.f32 %v84_v21, %v68_v17  ;;  %v75_v26 = vld [vmem:[#allocation2 + $0x38] sm:$0xff] }
  0x2e   :  { %117 = vst [vmem:[#allocation8 + $0x8] sm:$0xff] %v101_v16  ;;  %v804_v25 = vadd.f32 %v86_v22, %v70_v18  ;;  %v89_v27 = vld [vmem:[#allocation5 + $0x28] sm:$0xff]  ;;  %v91_v28 = vld [vmem:[#allocation5 + $0x38] sm:$0xff]  ;;  %119 = vst [vmem:[#allocation8 + $0x18] sm:$0xff] %v103_v20  ;;  %v133_v29 = vpack.c.bf16 %v103_v20, %v101_v16 }
  0x2f   :  { %v806_v30 = vadd.f32 %v89_v27, %v73_v23  ;;  %v808_v31 = vadd.f32 %v91_v28, %v75_v26  ;;  %v72_v32 = vld [vmem:[#allocation2 + $0x20] sm:$0xff]  ;;  %v74_v33 = vld [vmem:[#allocation2 + $0x30] sm:$0xff]  ;;  %v642_v35 = vld [vmem:[#allocation7 + $0x8] sm:$0xff]   ;;  %116 = vst [vmem:[#allocation8] sm:$0xff] %v802_v24 }
  0x30   :  { %550 = vmatpush3.bf16.msra.mxu0 %v634_v5  ;;  %v88_v34 = vld [vmem:[#allocation5 + $0x20] sm:$0xff]  ;;  %118 = vst [vmem:[#allocation8 + $0x10] sm:$0xff] %v804_v25  ;;  %v90_v36 = vld [vmem:[#allocation5 + $0x30] sm:$0xff]  ;;  %v77_v38 = vld [vmem:[#allocation2 + $0x48] sm:$0xff]  ;;  %307 = vmatprep.mubr.bf16.mxu0 %v133_v29  ;;  %v132_v4 = vpack.c.bf16 %v804_v25, %v802_v24 }
  0x31   :  { %551 = vmatprep.subr.bf16.mxu0 %v635_v6  ;;  %v104_v37 = vadd.f32 %v88_v34, %v72_v32  ;;  %v79_v39 = vld [vmem:[#allocation2 + $0x58] sm:$0xff]  ;;  %v643_v40 = vld [vmem:[#allocation7 + $0x40] sm:$0xff]   ;;  %121 = vst [vmem:[#allocation8 + $0x28] sm:$0xff] %v806_v30  ;;  %123 = vst [vmem:[#allocation8 + $0x38] sm:$0xff] %v808_v31  ;;  %v106_v41 = vadd.f32 %v90_v36, %v74_v33  ;;  %v135_v5 = vpack.c.bf16 %v808_v31, %v806_v30 }
  0x32   :  { %v93_v42 = vld [vmem:[#allocation5 + $0x48] sm:$0xff]  ;;  %v95_v43 = vld [vmem:[#allocation5 + $0x58] sm:$0xff]  ;;  %v76_v44 = vld [vmem:[#allocation2 + $0x40] sm:$0xff] }
  0x33   :  { %120 = vst [vmem:[#allocation8 + $0x20] sm:$0xff] %v104_v37  ;;  %v109_v45 = vadd.f32 %v93_v42, %v77_v38  ;;  %v111_v46 = vadd.f32 %v95_v43, %v79_v39  ;;  %v78_v47 = vld [vmem:[#allocation2 + $0x50] sm:$0xff]  ;;  %v92_v48 = vld [vmem:[#allocation5 + $0x40] sm:$0xff]  ;;  %122 = vst [vmem:[#allocation8 + $0x30] sm:$0xff] %v106_v41  ;;  %v134_v6 = vpack.c.bf16 %v106_v41, %v104_v37 }
  0x34   :  { %552 = vmatpush3.bf16.msra.mxu0 %v636_v7  ;;  %v94_v49 = vld [vmem:[#allocation5 + $0x50] sm:$0xff]  ;;  %v108_v50 = vadd.f32 %v92_v48, %v76_v44  ;;  %v81_v52 = vld [vmem:[#allocation2 + $0x68] sm:$0xff]  ;;  %v83_v53 = vld [vmem:[#allocation2 + $0x78] sm:$0xff] }
  0x35   :  { %553 = vmatprep.subr.bf16.mxu0 %v637_v8  ;;  %v110_v51 = vadd.f32 %v94_v49, %v78_v47  ;;  %v97_v54 = vld [vmem:[#allocation5 + $0x68] sm:$0xff]  ;;  %v644_v55 = vld [vmem:[#allocation7] sm:$0xff]   ;;  %125 = vst [vmem:[#allocation8 + $0x48] sm:$0xff] %v109_v45  ;;  %127 = vst [vmem:[#allocation8 + $0x58] sm:$0xff] %v111_v46  ;;  %v137_v7 = vpack.c.bf16 %v111_v46, %v109_v45 }
  0x36   :  { %v99_v56 = vld [vmem:[#allocation5 + $0x78] sm:$0xff]  ;;  %v113_v57 = vadd.f32 %v97_v54, %v81_v52  ;;  %v80_v58 = vld [vmem:[#allocation2 + $0x60] sm:$0xff]  ;;  %v82_v59 = vld [vmem:[#allocation2 + $0x70] sm:$0xff]  ;;  %124 = vst [vmem:[#allocation8 + $0x40] sm:$0xff] %v108_v50 }
  0x37   :  { %126 = vst [vmem:[#allocation8 + $0x50] sm:$0xff] %v110_v51  ;;  %v115_v60 = vadd.f32 %v99_v56, %v83_v53  ;;  %v96_v61 = vld [vmem:[#allocation5 + $0x60] sm:$0xff]  ;;  %v98_v62 = vld [vmem:[#allocation5 + $0x70] sm:$0xff]  ;;  %v645_v1 = vld [vmem:[%s890_s4 + $0x38] sm:$0xff]   ;;  %v136_v8 = vpack.c.bf16 %v110_v51, %v108_v50 }
  0x38   :  { %554 = vmatpush3.bf16.msra.mxu0 %v638_v9  ;;  %129 = vst [vmem:[#allocation8 + $0x68] sm:$0xff] %v113_v57  ;;  %v112_v63 = vadd.f32 %v96_v61, %v80_v58  ;;  %v114_v0 = vadd.f32 %v98_v62, %v82_v59  ;;  %v646_v2 = vld [vmem:[%s890_s4 + $0x30] sm:$0xff]   ;;  %597 = vmatprep.subr.bf16.mxu1 %v645_v1  ;;  %v647_v3 = vld [vmem:[%s890_s4 + $0x28] sm:$0xff]   ;;  %v648_v11 = vld [vmem:[%s890_s4 + $0x20] sm:$0xff]  }
  0x39   :  { %555 = vmatprep.subr.bf16.mxu0 %v639_v10  ;;  %131 = vst [vmem:[#allocation8 + $0x78] sm:$0xff] %v115_v60  ;;  %598 = vmatpush3.bf16.msra.mxu1 %v645_v1  ;;  %v139_v9 = vpack.c.bf16 %v115_v60, %v113_v57  ;;  %v649_v12 = vld [vmem:[%s890_s4 + $0x18] sm:$0xff]   ;;  %v650_v13 = vld [vmem:[%s890_s4 + $0x10] sm:$0xff]   ;;  %v652_v15 = vld [vmem:[%s890_s4] sm:$0xff]  }
  0x3a   :  { %128 = vst [vmem:[#allocation8 + $0x60] sm:$0xff] %v112_v63  ;;  %130 = vst [vmem:[#allocation8 + $0x70] sm:$0xff] %v114_v0  ;;  %599 = vmatprep.subr.bf16.mxu1 %v646_v2  ;;  %v138_v10 = vpack.c.bf16 %v114_v0, %v112_v63  ;;  %v519_v20 = vld [vmem:[%s889_s3] ss:$0 sm:$0xff]  ;;  %s746_s3 = smov [#allocation8]  }
  0x3c   :  { %556 = vmatpush3.bf16.msra.mxu0 %v640_v14  ;;  %v651_v14 = vld [vmem:[%s890_s4 + $0x8] sm:$0xff]   ;;  %s502_s4 = sshll.u32 %s746_s3, 4  ;;  %s503_s4 = int_to_ptr.vmem [resolvable:$true] %s502_s4 }
  0x3d   :  { %557 = vmatprep.subr.bf16.mxu0 %v641_v19  ;;  %600 = vmatpush3.bf16.msra.mxu1 %v646_v2  ;;  %s713_s14 = scalar_lea.vmem %s503_s4, 2048  ;;  %p718_p2 = scmp.lt.s32.totalorder %s503_s4, %s503_s4 }
  0x3e   :  { %601 = vmatprep.subr.bf16.mxu1 %v647_v3  ;;  %p714_p1 = scmp.ne.s32.totalorder %s503_s4, %s713_s14  ;;  %p719_p3 = scmp.lt.s32.totalorder %s713_s14, %s713_s14 }
  0x40   :  { %558 = vmatpush3.bf16.msra.mxu0 %v642_v35  ;;  %p720_p4 = por %p719_p3, %p718_p2 }
  0x41   :  { %559 = vmatprep.subr.bf16.mxu0 %v643_v40  ;;  %602 = vmatpush3.bf16.msra.mxu1 %v647_v3 }
  0x42   :  { %603 = vmatprep.subr.bf16.mxu1 %v648_v11  ;;  %p721_p5 = pnand %p720_p4, %p714_p1 }
  0x44   :  { %560 = vmatpush3.bf16.msra.mxu0 %v644_v55 }
  0x45   :  { %604 = vmatpush3.bf16.msra.mxu1 %v648_v11 }
  0x46   :  { %605 = vmatprep.subr.bf16.mxu1 %v649_v12 }
  0x47   :  { %308 = vmatmul.mubr.bf16.vlgmr.msra.gmra.mxu0 %v132_v4 }
  0x48   :  { %315 = vmatprep.mubr.bf16.mxu0 %v135_v5 }
  0x49   :  { %606 = vmatpush3.bf16.msra.mxu1 %v649_v12 }
  0x4a   :  { %607 = vmatprep.subr.bf16.mxu1 %v650_v13 }
  0x4d   :  { %608 = vmatpush3.bf16.msra.mxu1 %v650_v13 }
  0x4e   :  { %609 = vmatprep.subr.bf16.mxu1 %v651_v14 }
  0x4f   :  { %316 = vmatmul.mubr.bf16.gmra.mxu0 %v134_v6 }
  0x50   :  { %323 = vmatprep.mubr.bf16.mxu0 %v137_v7 }
  0x51   :  { %610 = vmatpush3.bf16.msra.mxu1 %v651_v14 }
  0x52   :  { %611 = vmatprep.subr.bf16.mxu1 %v652_v15 }
  0x55   :  { %612 = vmatpush3.bf16.msra.mxu1 %v652_v15 }
  0x57   :  { %324 = vmatmul.mubr.bf16.gmra.mxu0 %v136_v8 }
  0x58   :  { %331 = vmatprep.mubr.bf16.mxu0 %v139_v9 }
  0x5f   :  { %332 = vmatmul.mubr.bf16.gmra.mxu0 %v138_v10 }
 0x107   :  { %v561_v16 = vpop.f32.mrf.mxu0 }
 0x109   :  { %v562_v17 = vpop.f32.mrf.mxu0 }
 0x10a   :  { %v563_v18 = vadd.f32 %v562_v17, %v561_v16 }
 0x10b   :  { %v564_v19 = vpop.f32.mrf.mxu0 }
 0x10c   :  { %v310_v23 = vadd.f32 %v563_v18, %v519_v20 }
 0x10d   :  { %v565_v21 = vpop.f32.mrf.mxu0 }
 0x10e   :  { %v566_v22 = vadd.f32 %v565_v21, %v564_v19  ;;  %v340_v28 = vmax.f32 %v310_v23, 0.0 }
 0x10f   :  { %v567_v24 = vpop.f32.mrf.mxu0 }
 0x110   :  { %v313_v25 = vadd.f32 %v566_v22, %v519_v20 }
 0x111   :  { %v568_v26 = vpop.f32.mrf.mxu0 }
 0x112   :  { %v569_v27 = vadd.f32 %v568_v26, %v567_v24  ;;  %v341_v29 = vmax.f32 %v313_v25, 0.0 }
 0x113   :  { %v570_v30 = vpop.f32.mrf.mxu0 }
 0x114   :  { %v348_v31 = vpack.c.bf16 %v341_v29, %v340_v28  ;;  %v318_v33 = vadd.f32 %v569_v27, %v519_v20 }
 0x115   :  { %v571_v32 = vpop.f32.mrf.mxu0 }
 0x116   :  { %v572_v34 = vadd.f32 %v571_v32, %v570_v30  ;;  %613 = vmatprep.mubr.bf16.mxu1 %v348_v31  ;;  %v342_v38 = vmax.f32 %v318_v33, 0.0 }
 0x117   :  { %v573_v35 = vpop.f32.mrf.mxu0 }
 0x118   :  { %v321_v36 = vadd.f32 %v572_v34, %v519_v20 }
 0x119   :  { %v574_v37 = vpop.f32.mrf.mxu0 }
 0x11a   :  { %v343_v39 = vmax.f32 %v321_v36, 0.0  ;;  %v575_v40 = vadd.f32 %v574_v37, %v573_v35 }
 0x11b   :  { %v576_v41 = vpop.f32.mrf.mxu0 }
 0x11c   :  { %v349_v42 = vpack.c.bf16 %v343_v39, %v342_v38  ;;  %v326_v44 = vadd.f32 %v575_v40, %v519_v20 }
 0x11d   :  { %v577_v43 = vpop.f32.mrf.mxu0 }
 0x11e   :  { %v578_v45 = vadd.f32 %v577_v43, %v576_v41  ;;  %614 = vmatmul.mubr.bf16.vlgmr.msra.gmra.mxu1 %v349_v42  ;;  %v344_v49 = vmax.f32 %v326_v44, 0.0 }
 0x11f   :  { %v579_v46 = vpop.f32.mrf.mxu0 }
 0x120   :  { %v329_v47 = vadd.f32 %v578_v45, %v519_v20 }
 0x121   :  { %v580_v48 = vpop.f32.mrf.mxu0 }
 0x122   :  { %v345_v50 = vmax.f32 %v329_v47, 0.0  ;;  %v581_v51 = vadd.f32 %v580_v48, %v579_v46 }
 0x123   :  { %v582_v52 = vpop.f32.mrf.mxu0 }
 0x124   :  { %v350_v53 = vpack.c.bf16 %v345_v50, %v344_v49  ;;  %v334_v55 = vadd.f32 %v581_v51, %v519_v20 }
 0x125   :  { %v583_v54 = vpop.f32.mrf.mxu0 }
 0x126   :  { %v584_v56 = vadd.f32 %v583_v54, %v582_v52  ;;  %617 = vmatprep.mubr.bf16.mxu1 %v350_v53  ;;  %v346_v58 = vmax.f32 %v334_v55, 0.0 }
 0x128   :  { %v337_v57 = vadd.f32 %v584_v56, %v519_v20 }
 0x12a   :  { %v347_v59 = vmax.f32 %v337_v57, 0.0 }
 0x12c   :  { %v351_v60 = vpack.c.bf16 %v347_v59, %v346_v58 }
 0x12e   :  { %618 = vmatmul.mubr.bf16.gmra.mxu1 %v351_v60 }
 0x12f   :  { %724 = shalt.err (!%p721_p5)
}
 0x130   :  { %508 = dma.vmem_to_hbm [thread:$0]  %s503_s4, 2048, %s892_s6, [#allocation4], %s741_s29, %s741_s29, %s742_s30   ;;  %vm488_vm0 = vcmask 15360  }
 0x131   :  { %v536_v61 = vld [vmem:[%s891_s5] ss:$0 sm:$0xff] }
 0x1de   :  { %v615_v62 = vpop.f32.mrf.mxu1 }
 0x1df   :  { %v466_v63 = vadd.f32 %v615_v62, %v536_v61 }
 0x1e0   :  { %v457_v0 = vpop.f32.mrf.mxu1 }
 0x1e1   :  { %491 = vst.msk [vmem:[%s893_s7 + $0x10] sm:$0xff] %vm488_vm0, %v466_v63  ;;  %v458_v1 = vadd.f32 %v536_v61, %v457_v0 }
 0x1e2   :  { %v616_v2 = vpop.f32.mrf.mxu1 }
 0x1e3   :  { %489 = vst.msk [vmem:[%s893_s7] sm:$0xff] %vm488_vm0, %v458_v1  ;;  %v469_v3 = vadd.f32 %v616_v2, %v536_v61 }
 0x1e4   :  { %v460_v4 = vpop.f32.mrf.mxu1 }
 0x1e5   :  { %492 = vst.msk [vmem:[%s893_s7 + $0x18] sm:$0xff] %vm488_vm0, %v469_v3  ;;  %v461_v5 = vadd.f32 %v536_v61, %v460_v4 }
 0x1e7   :  { %490 = vst.msk [vmem:[%s893_s7 + $0x8] sm:$0xff] %vm488_vm0, %v461_v5 }
 0x1ee   :  { %v619_v6 = vpop.f32.mrf.mxu1 }
 0x1ef   :  { %v482_v7 = vadd.f32 %v619_v6, %v536_v61 }
 0x1f0   :  { %v473_v8 = vpop.f32.mrf.mxu1 }
 0x1f1   :  { %495 = vst.msk [vmem:[%s893_s7 + $0x30] sm:$0xff] %vm488_vm0, %v482_v7  ;;  %v474_v9 = vadd.f32 %v536_v61, %v473_v8 }
 0x1f2   :  { %v620_v10 = vpop.f32.mrf.mxu1 }
 0x1f3   :  { %493 = vst.msk [vmem:[%s893_s7 + $0x20] sm:$0xff] %vm488_vm0, %v474_v9  ;;  %v485_v11 = vadd.f32 %v620_v10, %v536_v61 }
 0x1f4   :  { %v476_v12 = vpop.f32.mrf.mxu1 }
 0x1f5   :  { %496 = vst.msk [vmem:[%s893_s7 + $0x38] sm:$0xff] %vm488_vm0, %v485_v11  ;;  %v477_v13 = vadd.f32 %v536_v61, %v476_v12 }
 0x1f7   :  { %494 = vst.msk [vmem:[%s893_s7 + $0x28] sm:$0xff] %vm488_vm0, %v477_v13 }
 0x1f8   :  { %737 = dma.done.wait [#allocation4], 2048  }
 0x1f9   :  { %738 = vsyncadd [#allocation4], 4294965248 }
 0x1fa   :  { %516 = vsyncpa [#allocation3], 1 }
 0x1fb   :  { %517 = vsyncpa [#allocation6], 1 }
 0x1fc   :  { %518 = vsyncpa [#allocation4], 1 }

</bundles_post_ra>
